<compile_context>
chip_gen: v7x
topology: tpu7x:2x2x1
jax: 0.10.0
libtpu: 0.0.40
codegen_flags: <defaults>
</compile_context>

<pallas_src>
import jax
import jax.numpy as jnp
from jax.experimental import pallas as pl
from jax.experimental.pallas import tpu as pltpu

# ---- synthetic "config" (configparser values in the original module) ----
NUM_KEYPOINTS = 21          # MediaPipe hand keypoints
NUM_CLASSES = 10
IN_DIM = NUM_KEYPOINTS * 2  # 42 (kept unpadded)
H1 = 512
H2 = 256
LN_EPS = 1e-5

OUT_PAD = 128               # 10 -> 128 lane-dense logits (zero-padded w3/b3 columns)

_MAX_BLOCK_B = 2048         # VMEM-safe tile cap (v7x: 64 MiB / TensorCore)
_SINGLE_TILE_B = 256        # below this a single tile is fine (splitting = pure overhead)


def _round_up(n, m):
    return ((n + m - 1) // m) * m


def _choose_block_b(B):
    b_req = _round_up(B, 16)             # bf16 sublane packing: 16-row granularity
    if b_req <= _SINGLE_TILE_B:
        return b_req                     # small batch: one tile
    # >= 2 grid steps so the "parallel" batch axis spans both v7x TensorCores,
    # tile size capped at _MAX_BLOCK_B rows to stay well under the VMEM budget.
    n_blocks = max(2, pl.cdiv(b_req, _MAX_BLOCK_B))
    return _round_up(pl.cdiv(b_req, n_blocks), 16)


def _layernorm(h, gamma, beta):
    # two-pass (centered) variance: same cost as one-pass here (d is reused), better numerics
    mu = jnp.mean(h, axis=-1, keepdims=True)
    d = h - mu
    var = jnp.mean(d * d, axis=-1, keepdims=True)
    return d * jax.lax.rsqrt(var + LN_EPS) * gamma + beta


def gesture_mlp_kernel(
    x_ref,
    w1_ref, b1_ref, g1_ref, be1_ref,
    w2_ref, b2_ref, g2_ref, be2_ref,
    w3_ref, b3_ref,
    out_ref,
):
    x = x_ref[...]  # (TB, 42) f32

    # Linear(42->512) + LayerNorm(512) + ReLU   (Dropout = identity in eval)
    h = jnp.dot(x.astype(jnp.bfloat16), w1_ref[...],
                preferred_element_type=jnp.float32) + b1_ref[...]
    h = jnp.maximum(_layernorm(h, g1_ref[...], be1_ref[...]), 0.0)
    # TODO(synk): Dropout(p=0.3) training-mode masking not implemented (eval identity).

    # Linear(512->256) + LayerNorm(256) + ReLU
    h = jnp.dot(h.astype(jnp.bfloat16), w2_ref[...],
                preferred_element_type=jnp.float32) + b2_ref[...]
    h = jnp.maximum(_layernorm(h, g2_ref[...], be2_ref[...]), 0.0)

    # Linear(256 -> OUT_PAD)   (cols >= NUM_CLASSES are zero-padded in the packed weights)
    out = jnp.dot(h.astype(jnp.bfloat16), w3_ref[...],
                  preferred_element_type=jnp.float32) + b3_ref[...]
    out_ref[...] = out.astype(out_ref.dtype)   # bf16 lane-dense (unmasked) store


def gesture_classifier_forward(x, params, *, block_b=None):
    """x: (B, IN_DIM) float32.  params: pre-packed weights (see init_params)."""
    B = x.shape[0]
    if block_b is None:
        block_b = _choose_block_b(B)
    n_blocks = pl.cdiv(B, block_b)
    B_pad = n_blocks * block_b

    # Pad only the batch remainder, and only when needed (no full-array feature padding).
    x_in = x if B_pad == B else jnp.pad(x, ((0, B_pad - B), (0, 0)))

    # Resident (constant index_map) specs for all parameters; only x/out move per step.
    def resident(shape):
        return pl.BlockSpec(shape, lambda i: tuple(0 for _ in shape))

    in_specs = [
        pl.BlockSpec((block_b, IN_DIM), lambda i: (i, 0)),   # x: batch-tiled, full 42 lanes
        resident((IN_DIM, H1)), resident((1, H1)), resident((1, H1)), resident((1, H1)),
        resident((H1, H2)),     resident((1, H2)), resident((1, H2)), resident((1, H2)),
        resident((H2, OUT_PAD)), resident((1, OUT_PAD)),
    ]
    out_specs = pl.BlockSpec((block_b, OUT_PAD), lambda i: (i, 0))

    # ---- cost / VMEM estimates derived from the actual tiling and dtypes ----
    flops = 2 * B_pad * (IN_DIM * H1 + H1 * H2 + H2 * OUT_PAD)
    weight_bytes = (IN_DIM * H1 + H1 * H2 + H2 * OUT_PAD) * 2 \
        + (3 * H1 + 3 * H2 + OUT_PAD) * 4
    bytes_accessed = B_pad * IN_DIM * 4 + B_pad * OUT_PAD * 2 + weight_bytes

    io_vmem = 2 * block_b * (IN_DIM * 4 + OUT_PAD * 2)        # double-buffered x / out
    act_vmem = 3 * block_b * (H1 + H2 + OUT_PAD) * 4          # f32 intermediates + temps
    vmem_limit = int(min(56 * 2**20,
                         max(16 * 2**20,
                             1.25 * (2 * weight_bytes + io_vmem + act_vmem))))

    out_padded = pl.pallas_call(
        gesture_mlp_kernel,
        out_shape=jax.ShapeDtypeStruct((B_pad, OUT_PAD), jnp.bfloat16),
        grid=(n_blocks,),
        in_specs=in_specs,
        out_specs=out_specs,
        compiler_params=pltpu.CompilerParams(
            dimension_semantics=("parallel",),
            vmem_limit_bytes=vmem_limit,
        ),
        cost_estimate=pl.CostEstimate(
            flops=flops,
            transcendentals=2 * B_pad,          # one rsqrt per LayerNorm per row
            bytes_accessed=bytes_accessed,
        ),
    )(x_in,
      params["w1"], params["b1"], params["g1"], params["be1"],
      params["w2"], params["b2"], params["g2"], params["be2"],
      params["w3"], params["b3"])

    return out_padded[:B, :NUM_CLASSES].astype(jnp.float32)


def init_params(key):
    """Deterministic init matching the PyTorch layer shapes, pre-packed for the kernel:
    weights stored transposed (in, out) in bf16; w3/b3 zero-padded to OUT_PAD columns
    (one-time pack -> no per-call padding); biases / LN params stay f32."""
    keys = jax.random.split(key, 6)

    def linear(kw, kb, fan_in, fan_out):
        bound = 1.0 / jnp.sqrt(fan_in)
        w = jax.random.uniform(kw, (fan_in, fan_out), jnp.float32, -bound, bound)
        b = jax.random.uniform(kb, (1, fan_out), jnp.float32, -bound, bound)
        return w.astype(jnp.bfloat16), b

    w1, b1 = linear(keys[0], keys[1], IN_DIM, H1)
    w2, b2 = linear(keys[2], keys[3], H1, H2)
    w3, b3 = linear(keys[4], keys[5], H2, NUM_CLASSES)
    w3 = jnp.pad(w3, ((0, 0), (0, OUT_PAD - NUM_CLASSES)))   # (256, 128) bf16
    b3 = jnp.pad(b3, ((0, 0), (0, OUT_PAD - NUM_CLASSES)))   # (1, 128)  f32

    return dict(
        w1=w1, b1=b1,
        g1=jnp.ones((1, H1), jnp.float32), be1=jnp.zeros((1, H1), jnp.float32),
        w2=w2, b2=b2,
        g2=jnp.ones((1, H2), jnp.float32), be2=jnp.zeros((1, H2), jnp.float32),
        w3=w3, b3=b3,
    )


def reference_forward(x, p):
    """Pure-JAX reference mirroring the kernel's bf16-matmul / f32-vector math."""
    def dot(a, w):
        return jnp.dot(a.astype(jnp.bfloat16), w, preferred_element_type=jnp.float32)

    h = jnp.maximum(_layernorm(dot(x, p["w1"]) + p["b1"], p["g1"], p["be1"]), 0.0)
    h = jnp.maximum(_layernorm(dot(h, p["w2"]) + p["b2"], p["g2"], p["be2"]), 0.0)
    return (dot(h, p["w3"]) + p["b3"])[:, :NUM_CLASSES]


if __name__ == "__main__":
    key = jax.random.PRNGKey(0)
    k_params, k_x = jax.random.split(key)

    B = 8
    params = init_params(k_params)
    x = jax.random.normal(k_x, (B, IN_DIM), jnp.float32)

    out = gesture_classifier_forward(x, params)
    out = jax.block_until_ready(out)

    ref = reference_forward(x, params)
    assert out.shape == (B, NUM_CLASSES)
    # bf16 logit writeback -> allow small quantization tolerance vs. the f32-stored reference
    assert jnp.allclose(out, ref, atol=3e-2, rtol=3e-2), "mismatch vs reference"

    print("KERNEL_OK")
</pallas_src>

<mosaic_0001>
module attributes {stable_mosaic.version = 11 : i64} {
  func.func @gesture_mlp_kernel(%arg0: i32, %arg1: memref<16x42xf32, #tpu.memory_space<vmem>>, %arg2: memref<42x512xbf16, #tpu.memory_space<vmem>>, %arg3: memref<1x512xf32, #tpu.memory_space<vmem>>, %arg4: memref<1x512xf32, #tpu.memory_space<vmem>>, %arg5: memref<1x512xf32, #tpu.memory_space<vmem>>, %arg6: memref<512x256xbf16, #tpu.memory_space<vmem>>, %arg7: memref<1x256xf32, #tpu.memory_space<vmem>>, %arg8: memref<1x256xf32, #tpu.memory_space<vmem>>, %arg9: memref<1x256xf32, #tpu.memory_space<vmem>>, %arg10: memref<256x128xbf16, #tpu.memory_space<vmem>>, %arg11: memref<1x128xf32, #tpu.memory_space<vmem>>, %arg12: memref<16x128xbf16, #tpu.memory_space<vmem>>) attributes {dimension_semantics = [#tpu.dimension_semantics<parallel>], iteration_bounds = array<i64: 1>, scalar_prefetch = 0 : i64, scratch_operands = 0 : i64, tpu.core_type = #tpu.core_type<tc>, window_params = [{transform_indices = @transform_0, window_bounds = array<i64: 16, 42>}, {pipeline_mode = #tpu.pipeline_mode<synchronous>, transform_indices = @transform_1, window_bounds = array<i64: 42, 512>}, {pipeline_mode = #tpu.pipeline_mode<synchronous>, transform_indices = @transform_2, window_bounds = array<i64: 1, 512>}, {pipeline_mode = #tpu.pipeline_mode<synchronous>, transform_indices = @transform_3, window_bounds = array<i64: 1, 512>}, {pipeline_mode = #tpu.pipeline_mode<synchronous>, transform_indices = @transform_4, window_bounds = array<i64: 1, 512>}, {pipeline_mode = #tpu.pipeline_mode<synchronous>, transform_indices = @transform_5, window_bounds = array<i64: 512, 256>}, {pipeline_mode = #tpu.pipeline_mode<synchronous>, transform_indices = @transform_6, window_bounds = array<i64: 1, 256>}, {pipeline_mode = #tpu.pipeline_mode<synchronous>, transform_indices = @transform_7, window_bounds = array<i64: 1, 256>}, {pipeline_mode = #tpu.pipeline_mode<synchronous>, transform_indices = @transform_8, window_bounds = array<i64: 1, 256>}, {pipeline_mode = #tpu.pipeline_mode<synchronous>, transform_indices = @transform_9, window_bounds = array<i64: 256, 128>}, {pipeline_mode = #tpu.pipeline_mode<synchronous>, transform_indices = @transform_10, window_bounds = array<i64: 1, 128>}, {transform_indices = @transform_11, window_bounds = array<i64: 16, 128>}]} {
    %c0 = arith.constant 0 : index
    %c0_0 = arith.constant 0 : index
    %0 = vector.load %arg1[%c0, %c0_0] : memref<16x42xf32, #tpu.memory_space<vmem>>, vector<16x42xf32>
    %1 = arith.truncf %0 : vector<16x42xf32> to vector<16x42xbf16>
    %c0_1 = arith.constant 0 : index
    %c0_2 = arith.constant 0 : index
    %2 = vector.load %arg2[%c0_1, %c0_2] : memref<42x512xbf16, #tpu.memory_space<vmem>>, vector<42x512xbf16>
    %cst = arith.constant dense<0.000000e+00> : vector<16x512xf32>
    %3 = tpu.matmul %1, %2, %cst {dimension_numbers = #tpu.dot_dimension_numbers<[1], [0], [0], [1], [0, 0, 1, 1], [], []>} : vector<16x42xbf16>, vector<42x512xbf16>, vector<16x512xf32> -> vector<16x512xf32>
    %c0_3 = arith.constant 0 : index
    %c0_4 = arith.constant 0 : index
    %4 = vector.load %arg3[%c0_3, %c0_4] : memref<1x512xf32, #tpu.memory_space<vmem>>, vector<1x512xf32>
    %5 = vector.broadcast %4 : vector<1x512xf32> to vector<16x512xf32>
    %6 = arith.addf %3, %5 : vector<16x512xf32>
    %c0_5 = arith.constant 0 : index
    %c0_6 = arith.constant 0 : index
    %7 = vector.load %arg4[%c0_5, %c0_6] : memref<1x512xf32, #tpu.memory_space<vmem>>, vector<1x512xf32>
    %c0_7 = arith.constant 0 : index
    %c0_8 = arith.constant 0 : index
    %8 = vector.load %arg5[%c0_7, %c0_8] : memref<1x512xf32, #tpu.memory_space<vmem>>, vector<1x512xf32>
    %cst_9 = arith.constant dense<0.000000e+00> : vector<16xf32>
    %9 = vector.multi_reduction <add>, %6, %cst_9 [1] : vector<16x512xf32> to vector<16xf32>
    %10 = vector.shape_cast %9 : vector<16xf32> to vector<16x1xf32>
    %cst_10 = arith.constant 5.120000e+02 : f32
    %11 = vector.broadcast %cst_10 : f32 to vector<16x1xf32>
    %12 = arith.divf %10, %11 : vector<16x1xf32>
    %13 = vector.broadcast %12 : vector<16x1xf32> to vector<16x512xf32>
    %14 = arith.subf %6, %13 : vector<16x512xf32>
    %15 = arith.mulf %14, %14 : vector<16x512xf32>
    %cst_11 = arith.constant dense<0.000000e+00> : vector<16xf32>
    %16 = vector.multi_reduction <add>, %15, %cst_11 [1] : vector<16x512xf32> to vector<16xf32>
    %17 = vector.shape_cast %16 : vector<16xf32> to vector<16x1xf32>
    %cst_12 = arith.constant 5.120000e+02 : f32
    %18 = vector.broadcast %cst_12 : f32 to vector<16x1xf32>
    %19 = arith.divf %17, %18 : vector<16x1xf32>
    %cst_13 = arith.constant 9.99999974E-6 : f32
    %20 = vector.broadcast %cst_13 : f32 to vector<16x1xf32>
    %21 = arith.addf %19, %20 : vector<16x1xf32>
    %22 = math.rsqrt %21 : vector<16x1xf32>
    %23 = vector.broadcast %22 : vector<16x1xf32> to vector<16x512xf32>
    %24 = arith.mulf %14, %23 : vector<16x512xf32>
    %25 = vector.broadcast %7 : vector<1x512xf32> to vector<16x512xf32>
    %26 = arith.mulf %24, %25 : vector<16x512xf32>
    %27 = vector.broadcast %8 : vector<1x512xf32> to vector<16x512xf32>
    %28 = arith.addf %26, %27 : vector<16x512xf32>
    %cst_14 = arith.constant 0.000000e+00 : f32
    %29 = vector.broadcast %cst_14 : f32 to vector<16x512xf32>
    %30 = arith.maximumf %28, %29 : vector<16x512xf32>
    %31 = arith.truncf %30 : vector<16x512xf32> to vector<16x512xbf16>
    %c0_15 = arith.constant 0 : index
    %c0_16 = arith.constant 0 : index
    %32 = vector.load %arg6[%c0_15, %c0_16] : memref<512x256xbf16, #tpu.memory_space<vmem>>, vector<512x256xbf16>
    %cst_17 = arith.constant dense<0.000000e+00> : vector<16x256xf32>
    %33 = tpu.matmul %31, %32, %cst_17 {dimension_numbers = #tpu.dot_dimension_numbers<[1], [0], [0], [1], [0, 0, 1, 1], [], []>} : vector<16x512xbf16>, vector<512x256xbf16>, vector<16x256xf32> -> vector<16x256xf32>
    %c0_18 = arith.constant 0 : index
    %c0_19 = arith.constant 0 : index
    %34 = vector.load %arg7[%c0_18, %c0_19] : memref<1x256xf32, #tpu.memory_space<vmem>>, vector<1x256xf32>
    %35 = vector.broadcast %34 : vector<1x256xf32> to vector<16x256xf32>
    %36 = arith.addf %33, %35 : vector<16x256xf32>
    %c0_20 = arith.constant 0 : index
    %c0_21 = arith.constant 0 : index
    %37 = vector.load %arg8[%c0_20, %c0_21] : memref<1x256xf32, #tpu.memory_space<vmem>>, vector<1x256xf32>
    %c0_22 = arith.constant 0 : index
    %c0_23 = arith.constant 0 : index
    %38 = vector.load %arg9[%c0_22, %c0_23] : memref<1x256xf32, #tpu.memory_space<vmem>>, vector<1x256xf32>
    %cst_24 = arith.constant dense<0.000000e+00> : vector<16xf32>
    %39 = vector.multi_reduction <add>, %36, %cst_24 [1] : vector<16x256xf32> to vector<16xf32>
    %40 = vector.shape_cast %39 : vector<16xf32> to vector<16x1xf32>
    %cst_25 = arith.constant 2.560000e+02 : f32
    %41 = vector.broadcast %cst_25 : f32 to vector<16x1xf32>
    %42 = arith.divf %40, %41 : vector<16x1xf32>
    %43 = vector.broadcast %42 : vector<16x1xf32> to vector<16x256xf32>
    %44 = arith.subf %36, %43 : vector<16x256xf32>
    %45 = arith.mulf %44, %44 : vector<16x256xf32>
    %cst_26 = arith.constant dense<0.000000e+00> : vector<16xf32>
    %46 = vector.multi_reduction <add>, %45, %cst_26 [1] : vector<16x256xf32> to vector<16xf32>
    %47 = vector.shape_cast %46 : vector<16xf32> to vector<16x1xf32>
    %cst_27 = arith.constant 2.560000e+02 : f32
    %48 = vector.broadcast %cst_27 : f32 to vector<16x1xf32>
    %49 = arith.divf %47, %48 : vector<16x1xf32>
    %cst_28 = arith.constant 9.99999974E-6 : f32
    %50 = vector.broadcast %cst_28 : f32 to vector<16x1xf32>
    %51 = arith.addf %49, %50 : vector<16x1xf32>
    %52 = math.rsqrt %51 : vector<16x1xf32>
    %53 = vector.broadcast %52 : vector<16x1xf32> to vector<16x256xf32>
    %54 = arith.mulf %44, %53 : vector<16x256xf32>
    %55 = vector.broadcast %37 : vector<1x256xf32> to vector<16x256xf32>
    %56 = arith.mulf %54, %55 : vector<16x256xf32>
    %57 = vector.broadcast %38 : vector<1x256xf32> to vector<16x256xf32>
    %58 = arith.addf %56, %57 : vector<16x256xf32>
    %cst_29 = arith.constant 0.000000e+00 : f32
    %59 = vector.broadcast %cst_29 : f32 to vector<16x256xf32>
    %60 = arith.maximumf %58, %59 : vector<16x256xf32>
    %61 = arith.truncf %60 : vector<16x256xf32> to vector<16x256xbf16>
    %c0_30 = arith.constant 0 : index
    %c0_31 = arith.constant 0 : index
    %62 = vector.load %arg10[%c0_30, %c0_31] : memref<256x128xbf16, #tpu.memory_space<vmem>>, vector<256x128xbf16>
    %cst_32 = arith.constant dense<0.000000e+00> : vector<16x128xf32>
    %63 = tpu.matmul %61, %62, %cst_32 {dimension_numbers = #tpu.dot_dimension_numbers<[1], [0], [0], [1], [0, 0, 1, 1], [], []>} : vector<16x256xbf16>, vector<256x128xbf16>, vector<16x128xf32> -> vector<16x128xf32>
    %c0_33 = arith.constant 0 : index
    %c0_34 = arith.constant 0 : index
    %64 = vector.load %arg11[%c0_33, %c0_34] : memref<1x128xf32, #tpu.memory_space<vmem>>, vector<1x128xf32>
    %65 = vector.broadcast %64 : vector<1x128xf32> to vector<16x128xf32>
    %66 = arith.addf %63, %65 : vector<16x128xf32>
    %67 = arith.truncf %66 : vector<16x128xf32> to vector<16x128xbf16>
    %c0_35 = arith.constant 0 : index
    %c0_36 = arith.constant 0 : index
    %68 = vector.load %arg12[%c0_35, %c0_36] : memref<16x128xbf16, #tpu.memory_space<vmem>>, vector<16x128xbf16>
    tpu.vector_store %arg12[%c0_35, %c0_36], %67 {strides = array<i32>} : memref<16x128xbf16, #tpu.memory_space<vmem>>, vector<16x128xbf16>,
    return
  }
  func.func @transform_0(%arg0: i32) -> (i32, i32) {
    %c0_i32 = arith.constant 0 : i32
    %c0_i32_0 = arith.constant 0 : i32
    return %arg0, %c0_i32 : i32, i32
  }
  func.func @transform_1(%arg0: i32) -> (i32, i32) {
    %c0_i32 = arith.constant 0 : i32
    %c0_i32_0 = arith.constant 0 : i32
    %c0_i32_1 = arith.constant 0 : i32
    return %c0_i32, %c0_i32_0 : i32, i32
  }
  func.func @transform_2(%arg0: i32) -> (i32, i32) {
    %c0_i32 = arith.constant 0 : i32
    %c0_i32_0 = arith.constant 0 : i32
    %c0_i32_1 = arith.constant 0 : i32
    return %c0_i32, %c0_i32_0 : i32, i32
  }
  func.func @transform_3(%arg0: i32) -> (i32, i32) {
    %c0_i32 = arith.constant 0 : i32
    %c0_i32_0 = arith.constant 0 : i32
    %c0_i32_1 = arith.constant 0 : i32
    return %c0_i32, %c0_i32_0 : i32, i32
  }
  func.func @transform_4(%arg0: i32) -> (i32, i32) {
    %c0_i32 = arith.constant 0 : i32
    %c0_i32_0 = arith.constant 0 : i32
    %c0_i32_1 = arith.constant 0 : i32
    return %c0_i32, %c0_i32_0 : i32, i32
  }
  func.func @transform_5(%arg0: i32) -> (i32, i32) {
    %c0_i32 = arith.constant 0 : i32
    %c0_i32_0 = arith.constant 0 : i32
    %c0_i32_1 = arith.constant 0 : i32
    return %c0_i32, %c0_i32_0 : i32, i32
  }
  func.func @transform_6(%arg0: i32) -> (i32, i32) {
    %c0_i32 = arith.constant 0 : i32
    %c0_i32_0 = arith.constant 0 : i32
    %c0_i32_1 = arith.constant 0 : i32
    return %c0_i32, %c0_i32_0 : i32, i32
  }
  func.func @transform_7(%arg0: i32) -> (i32, i32) {
    %c0_i32 = arith.constant 0 : i32
    %c0_i32_0 = arith.constant 0 : i32
    %c0_i32_1 = arith.constant 0 : i32
    return %c0_i32, %c0_i32_0 : i32, i32
  }
  func.func @transform_8(%arg0: i32) -> (i32, i32) {
    %c0_i32 = arith.constant 0 : i32
    %c0_i32_0 = arith.constant 0 : i32
    %c0_i32_1 = arith.constant 0 : i32
    return %c0_i32, %c0_i32_0 : i32, i32
  }
  func.func @transform_9(%arg0: i32) -> (i32, i32) {
    %c0_i32 = arith.constant 0 : i32
    %c0_i32_0 = arith.constant 0 : i32
    %c0_i32_1 = arith.constant 0 : i32
    return %c0_i32, %c0_i32_0 : i32, i32
  }
  func.func @transform_10(%arg0: i32) -> (i32, i32) {
    %c0_i32 = arith.constant 0 : i32
    %c0_i32_0 = arith.constant 0 : i32
    %c0_i32_1 = arith.constant 0 : i32
    return %c0_i32, %c0_i32_0 : i32, i32
  }
  func.func @transform_11(%arg0: i32) -> (i32, i32) {
    %c0_i32 = arith.constant 0 : i32
    %c0_i32_0 = arith.constant 0 : i32
    return %arg0, %c0_i32 : i32, i32
  }
}

</mosaic_0001>

<bundles_post_ra>
// kernel: tpu_custom_call.1
= control target key start
LH: loop header
LB: loop body
LE: loop exit
PB: predicated region body
PF: predicated region fallthrough
CT: control target
= control target key end

     0   :  { %16 = vsyncpa [#allocation3], 0  ;;  %s1846_s0 = inlined_call_operand.hbm [shape: f32[16,42], index: 0, kind: input, shape index: {}]   ;;  %s1847_s1 = inlined_call_operand.hbm [shape: bf16[42,512], index: 1, kind: input, shape index: {}]   ;;  %s1848_s2 = inlined_call_operand.vmem [shape: f32[1,512], index: 2, kind: input, shape index: {}]   ;;  %s1849_s3 = inlined_call_operand.vmem [shape: f32[1,512], index: 3, kind: input, shape index: {}]   ;;  %s1850_s4 = inlined_call_operand.vmem [shape: f32[1,512], index: 4, kind: input, shape index: {}]   ;;  %s1851_s5 = inlined_call_operand.hbm [shape: bf16[512,256], index: 5, kind: input, shape index: {}]   ;;  %s1852_s6 = inlined_call_operand.vmem [shape: f32[1,256], index: 6, kind: input, shape index: {}]   ;;  %s1853_s7 = inlined_call_operand.vmem [shape: f32[1,256], index: 7, kind: input, shape index: {}]   ;;  %s1854_s8 = inlined_call_operand.vmem [shape: f32[1,256], index: 8, kind: input, shape index: {}]   ;;  %s1855_s9 = inlined_call_operand.hbm [shape: bf16[256,128], index: 9, kind: input, shape index: {}]   ;;  %s1856_s10 = inlined_call_operand.vmem [shape: f32[1,128], index: 10, kind: input, shape index: {}]   ;;  %s1857_s11 = inlined_call_operand.hbm [shape: bf16[16,128], index: 11, kind: output, shape index: {}]  }
   0x1   :  { %17 = vsyncpa [#allocation6], 0 }
   0x2   :  { %18 = vsyncpa [#allocation9], 0 }
   0x3   :  { %19 = vsyncpa [#allocation4], 0  ;;  %s1578_s17 = smov [#allocation5]   ;;  %s1460_s21 = scalar_lea.hbm %s1847_s1, 1536 }
   0x4   :  { %s37_s18 = sshll.u32 %s1578_s17, 4  ;;  %p1461_p0 = scmp.ne.s32.totalorder %s1847_s1, %s1460_s21  ;;  %s38_s18 = int_to_ptr.vmem [resolvable:$true] %s37_s18 }
   0x5   :  { %p1464_p1 = scmp.lt.u32.totalorder %s1460_s21, %s1847_s1 }
   0x7   :  { %p1466_p2 = pnand %p1464_p1, %p1461_p0 }
   0x9   :  { %1469 = shalt.err (!%p1466_p2)
}
   0xa   :  { %s1470_s26 = scalar_lea.vmem %s38_s18, 1536  ;;  %p1475_p4 = scmp.lt.s32.totalorder %s38_s18, %s38_s18 }
   0xb   :  { %p1471_p3 = scmp.ne.s32.totalorder %s38_s18, %s1470_s26  ;;  %p1476_p5 = scmp.lt.s32.totalorder %s1470_s26, %s1470_s26 }
   0xd   :  { %p1477_p6 = por %p1476_p5, %p1475_p4 }
   0xf   :  { %p1478_p7 = pnand %p1477_p6, %p1471_p3 }
  0x11   :  { %1481 = shalt.err (!%p1478_p7)
}
  0x12   :  { %s1579_s27 = smov 256   ;;  %s1580_s28 = smov 16  }
  0x13   :  { %43 = dma.hbm_to_vmem [thread:$0]  %s1847_s1, 1536, %s38_s18, [#allocation6], %s1579_s27, %s1579_s27, %s1580_s28  }
  0x14   :  { %s1581_s12 = smov [#allocation2]   ;;  %s1482_s16 = scalar_lea.hbm %s1846_s0, 256 }
  0x15   :  { %s25_s13 = sshll.u32 %s1581_s12, 4  ;;  %p1483_p8 = scmp.ne.s32.totalorder %s1846_s0, %s1482_s16  ;;  %s26_s13 = int_to_ptr.vmem [resolvable:$true] %s25_s13 }
  0x16   :  { %p1486_p9 = scmp.lt.u32.totalorder %s1482_s16, %s1846_s0 }
  0x18   :  { %p1488_p10 = pnand %p1486_p9, %p1483_p8 }
  0x1a   :  { %1491 = shalt.err (!%p1488_p10)
}
  0x1b   :  { %s1492_s22 = scalar_lea.vmem %s26_s13, 256  ;;  %p1497_p12 = scmp.lt.s32.totalorder %s26_s13, %s26_s13 }
  0x1c   :  { %p1493_p11 = scmp.ne.s32.totalorder %s26_s13, %s1492_s22  ;;  %p1498_p13 = scmp.lt.s32.totalorder %s1492_s22, %s1492_s22 }
  0x1e   :  { %p1499_p0 = por %p1498_p13, %p1497_p12 }
  0x20   :  { %p1500_p1 = pnand %p1499_p0, %p1493_p11 }
  0x22   :  { %1503 = shalt.err (!%p1500_p1)
}
  0x23   :  { %s1582_s1 = smov 128   ;;  %s1583_s18 = smov 8  }
  0x24   :  { %31 = dma.hbm_to_vmem [thread:$0]  %s1846_s0, 256, %s26_s13, [#allocation3], %s1582_s1, %s1582_s1, %s1583_s18  }
  0x25   :  { %s1584_s25 = smov [#allocation7]   ;;  %s1585_s27 = smov [#allocation8]  }
  0x26   :  { %s55_s26 = sshll.u32 %s1584_s25, 4  ;;  %s73_s28 = sshll.u32 %s1585_s27, 4  ;;  %s56_s26 = int_to_ptr.vmem [resolvable:$true] %s55_s26  ;;  %s1674_s28 = int_to_ptr.vmem [resolvable:$true] %s73_s28 }
  0x27   :  { %s1504_s12 = scalar_lea.hbm %s1851_s5, 8192 }
  0x28   :  { %p1505_p2 = scmp.ne.s32.totalorder %s1851_s5, %s1504_s12  ;;  %p1508_p3 = scmp.lt.u32.totalorder %s1504_s12, %s1851_s5 }
  0x2a   :  { %p1510_p4 = pnand %p1508_p3, %p1505_p2 }
  0x2c   :  { %1513 = shalt.err (!%p1510_p4)
}
  0x2d   :  { %s1514_s0 = scalar_lea.vmem %s56_s26, 8192  ;;  %p1519_p6 = scmp.lt.s32.totalorder %s56_s26, %s56_s26 }
  0x2e   :  { %p1515_p5 = scmp.ne.s32.totalorder %s56_s26, %s1514_s0  ;;  %p1520_p7 = scmp.lt.s32.totalorder %s1514_s0, %s1514_s0 }
  0x30   :  { %p1521_p8 = por %p1520_p7, %p1519_p6 }
  0x32   :  { %p1522_p9 = pnand %p1521_p8, %p1515_p5 }
  0x34   :  { %1525 = shalt.err (!%p1522_p9)
}
  0x35   :  { %61 = dma.hbm_to_vmem [thread:$0]  %s1851_s5, 8192, %s56_s26, [#allocation6], %s1582_s1, %s1582_s1, %s1583_s18  }
  0x36   :  { %s1526_s22 = scalar_lea.hbm %s1855_s9, 2048 }
  0x37   :  { %p1527_p10 = scmp.ne.s32.totalorder %s1855_s9, %s1526_s22  ;;  %p1530_p11 = scmp.lt.u32.totalorder %s1526_s22, %s1855_s9 }
  0x39   :  { %p1532_p12 = pnand %p1530_p11, %p1527_p10 }
  0x3b   :  { %1535 = shalt.err (!%p1532_p12)
}
  0x3c   :  { %s1536_s29 = scalar_lea.vmem %s1674_s28, 2048  ;;  %p1541_p0 = scmp.lt.s32.totalorder %s1674_s28, %s1674_s28 }
  0x3d   :  { %p1537_p13 = scmp.ne.s32.totalorder %s1674_s28, %s1536_s29  ;;  %p1542_p1 = scmp.lt.s32.totalorder %s1536_s29, %s1536_s29 }
  0x3f   :  { %p1543_p2 = por %p1542_p1, %p1541_p0 }
  0x41   :  { %p1544_p3 = pnand %p1543_p2, %p1537_p13 }
  0x43   :  { %1547 = shalt.err (!%p1544_p3)
}
  0x44   :  { %s1586_s5 = smov 64   ;;  %s1587_s1 = smov 4  }
  0x45   :  { %79 = dma.hbm_to_vmem [thread:$0]  %s1855_s9, 2048, %s1674_s28, [#allocation9], %s1586_s5, %s1586_s5, %s1587_s1  }
  0x46   :  { %1570 = dma.done.wait [#allocation3], 256  }
  0x47   :  { %1571 = vsyncadd [#allocation3], 4294967040 }
  0x48   :  { %1572 = dma.done.wait [#allocation6], 9728  }
  0x49   :  { %1573 = vsyncadd [#allocation6], 4294957568 }
  0x4a   :  { %1574 = dma.done.wait [#allocation9], 2048  }
  0x4b   :  { %1575 = vsyncadd [#allocation9], 4294965248  ;;  %v1588_v0 = vmov 0   ;;  %v1322_v1 = vld [vmem:[#allocation5 + $0x4] ss:$16 sps:$4 sm:$0xff]   ;;  %vm192_vm0 = vcmask 1044480   ;;  %v112_v18 = vlaneseq }
  0x4c   :  { %237 = vmatprep.mubr.bf16.mxu0 %v1588_v0  ;;  %v1324_v2 = vld [vmem:[#allocation5] ss:$16 sps:$4 sm:$0xff]   ;;  %205 = vmatprep.subr.bf16.mxu0 %v1322_v1  ;;  %v1325_v3 = vld [vmem:[#allocation5 + $0x24] ss:$16 sps:$4 sm:$0xff]   ;;  %v96_v8 = vld [vmem:[#allocation2 + $0x8] sm:$0xff]  ;;  %vm188_vm1 = vcmask 343040  }
  0x4d   :  { %v1327_v4 = vld [vmem:[#allocation5 + $0x20] ss:$16 sps:$4 sm:$0xff]   ;;  %206 = vmatpush1.bf16.msra.mxu0 %v1324_v2  ;;  %v1328_v5 = vld [vmem:[#allocation5 + $0x44] ss:$16 sps:$4 sm:$0x1f]   ;;  %v113_v19 = vshrl.u32 %v112_v18, 7 }
  0x4e   :  { %207 = vmatprep.subr.bf16.mxu0 %v1325_v3  ;;  %v1330_v6 = vld [vmem:[#allocation5 + $0x40] ss:$16 sps:$4 sm:$0x1f]   ;;  %v1333_v10 = vld [vmem:[#allocation5 + $0xc] ss:$16 sps:$4 sm:$0xff]   ;;  %s1589_s0 = smov [#allocation10]  }
  0x4f   :  { %v95_v7 = vld [vmem:[#allocation2] sm:$0xff]  ;;  %v194_v9 = vsel %vm192_vm0, %v1330_v6, 0  ;;  %v1331_v11 = vld [vmem:[#allocation5 + $0x8] ss:$16 sps:$4 sm:$0xff]   ;;  %v1336_v13 = vld [vmem:[#allocation5 + $0x2c] ss:$16 sps:$4 sm:$0xff]  }
  0x50   :  { %v97_v12 = vpack.c.bf16 %v96_v8, %v95_v7  ;;  %v1334_v14 = vld [vmem:[#allocation5 + $0x28] ss:$16 sps:$4 sm:$0xff]   ;;  %v1337_v15 = vld [vmem:[#allocation5 + $0x4c] ss:$16 sps:$4 sm:$0x1f]   ;;  %v1712_v21 = vsub.s32 0, %v113_v19 }
  0x51   :  { %208 = vmatpush1.bf16.msra.mxu0 %v1327_v4  ;;  %v1339_v16 = vld [vmem:[#allocation5 + $0x48] ss:$16 sps:$4 sm:$0x1f]   ;;  %v1714_v22 = vsub.s32 1, %v113_v19  ;;  %v110_v24 = vld [vmem:[%s1848_s2] sm:$0xf] }
  0x52   :  { %1186 = vmatprep.subr.msk.bf16.mxu0 %vm192_vm0, %v1328_v5  ;;  %v200_v17 = vsel %vm192_vm0, %v1339_v16, 0  ;;  %v115_v27 = vrot.slane %v110_v24, %v1712_v21  ;;  %v1721_v29 = vsub.s32 2, %v113_v19  ;;  %v1723_v30 = vsub.s32 3, %v113_v19  ;;  %v1340_v51 = vld [vmem:[#allocation7 + $0x4] ss:$8 sps:$4 sm:$0xff]   ;;  %s1160_s13 = sshll.u32 %s1589_s0, 4  ;;  %s1161_s13 = int_to_ptr.vmem [resolvable:$true] %s1160_s13 }
  0x53   :  { %v119_v28 = vrot.slane %v110_v24, %v1714_v22  ;;  %v1342_v52 = vld [vmem:[#allocation7 + $0x100] ss:$8 sps:$4 sm:$0xff]   ;;  %v1344_v53 = vld [vmem:[#allocation7 + $0x104] ss:$8 sps:$4 sm:$0xff]   ;;  %v1346_v55 = vld [vmem:[#allocation7 + $0x14] ss:$8 sps:$4 sm:$0xff]   ;;  %812 = vmatprep.subr.bf16.mxu1 %v1340_v51  ;;  %p1553_p5 = scmp.lt.s32.totalorder %s1161_s13, %s1161_s13 }
  0x54   :  { %v123_v33 = vrot.slane %v110_v24, %v1721_v29  ;;  %v127_v34 = vrot.slane %v110_v24, %v1723_v30  ;;  %v1345_v54 = vld [vmem:[#allocation7] ss:$8 sps:$4 sm:$0xff]   ;;  %v1350_v56 = vld [vmem:[#allocation7 + $0x114] ss:$8 sps:$4 sm:$0xff]   ;;  %v1348_v57 = vld [vmem:[#allocation7 + $0x110] ss:$8 sps:$4 sm:$0xff]  }
  0x55   :  { %210 = vmatpush1.bf16.msra.mxu0 %v194_v9  ;;  %813 = vmatpush1.bf16.msra.mxu1 %v1345_v54  ;;  %v1351_v58 = vld [vmem:[#allocation7 + $0x10] ss:$8 sps:$4 sm:$0xff]   ;;  %v1352_v59 = vld [vmem:[#allocation7 + $0x24] ss:$8 sps:$4 sm:$0xff]   ;;  %v1354_v61 = vld [vmem:[#allocation7 + $0x120] ss:$8 sps:$4 sm:$0xff]  }
  0x56   :  { %248 = vmatprep.subr.bf16.mxu0 %v1333_v10  ;;  %814 = vmatprep.subr.bf16.mxu1 %v1346_v55  ;;  %v1356_v60 = vld [vmem:[#allocation7 + $0x124] ss:$8 sps:$4 sm:$0xff]   ;;  %v1357_v62 = vld [vmem:[#allocation7 + $0x20] ss:$8 sps:$4 sm:$0xff]   ;;  %v1358_v63 = vld [vmem:[#allocation7 + $0x34] ss:$8 sps:$4 sm:$0xff]  }
  0x57   :  { %v1360_v1 = vld [vmem:[#allocation7 + $0x130] ss:$8 sps:$4 sm:$0xff]   ;;  %v1364_v3 = vld [vmem:[#allocation7 + $0x44] ss:$8 sps:$4 sm:$0xff]   ;;  %v1366_v5 = vld [vmem:[#allocation7 + $0x140] ss:$8 sps:$4 sm:$0xff]  }
  0x58   :  { %1187 = vmatmul.mubr.msk.bf16.vlgmr.msra.gmra.mrb[0].mxu0 %vm188_vm1, %v97_v12  ;;  %v1363_v2 = vld [vmem:[#allocation7 + $0x30] ss:$8 sps:$4 sm:$0xff]   ;;  %v1368_v4 = vld [vmem:[#allocation7 + $0x144] ss:$8 sps:$4 sm:$0xff]   ;;  %v1369_v6 = vld [vmem:[#allocation7 + $0x40] ss:$8 sps:$4 sm:$0xff]  }
  0x59   :  { %249 = vmatpush1.bf16.msra.mxu0 %v1331_v11  ;;  %280 = vmatprep.mubr.bf16.mxu0 %v1588_v0  ;;  %v1362_v0 = vld [vmem:[#allocation7 + $0x134] ss:$8 sps:$4 sm:$0xff]   ;;  %v1372_v9 = vld [vmem:[#allocation7 + $0x150] ss:$8 sps:$4 sm:$0xff]   ;;  %v1376_v11 = vld [vmem:[#allocation7 + $0x64] ss:$8 sps:$4 sm:$0xff]  }
  0x5a   :  { %250 = vmatprep.subr.bf16.mxu0 %v1336_v13  ;;  %815 = vmatpush1.bf16.msra.mxu1 %v1351_v58  ;;  %v1370_v7 = vld [vmem:[#allocation7 + $0x54] ss:$8 sps:$4 sm:$0xff]   ;;  %v1375_v10 = vld [vmem:[#allocation7 + $0x50] ss:$8 sps:$4 sm:$0xff]   ;;  %v1378_v13 = vld [vmem:[#allocation7 + $0x160] ss:$8 sps:$4 sm:$0xff]  }
  0x5b   :  { %816 = vmatprep.subr.bf16.mxu1 %v1352_v59  ;;  %v1374_v8 = vld [vmem:[#allocation7 + $0x154] ss:$8 sps:$4 sm:$0xff]   ;;  %v1387_v18 = vld [vmem:[#allocation7 + $0x70] ss:$8 sps:$4 sm:$0xff]   ;;  %v1388_v19 = vld [vmem:[#allocation7 + $0x84] ss:$8 sps:$4 sm:$0xff]  }
  0x5c   :  { %v1386_v16 = vld [vmem:[#allocation7 + $0x174] ss:$8 sps:$4 sm:$0xff]   ;;  %v1393_v24 = vld [vmem:[#allocation7 + $0x80] ss:$8 sps:$4 sm:$0xff]   ;;  %v1396_v55 = vld [vmem:[#allocation7 + $0x190] ss:$8 sps:$4 sm:$0xff]  }
  0x5d   :  { %251 = vmatpush1.bf16.msra.mxu0 %v1334_v14  ;;  %v1381_v14 = vld [vmem:[#allocation7 + $0x60] ss:$8 sps:$4 sm:$0xff]   ;;  %v1398_v54 = vld [vmem:[#allocation7 + $0x194] ss:$8 sps:$4 sm:$0xff]   ;;  %v1404_v58 = vld [vmem:[#allocation7 + $0x1a4] ss:$8 sps:$4 sm:$0xff]  }
  0x5e   :  { %1188 = vmatprep.subr.msk.bf16.mxu0 %vm192_vm0, %v1337_v15  ;;  %817 = vmatpush1.bf16.msra.mxu1 %v1357_v62  ;;  %v1382_v15 = vld [vmem:[#allocation7 + $0x74] ss:$8 sps:$4 sm:$0xff]   ;;  %v1402_v59 = vld [vmem:[#allocation7 + $0x1a0] ss:$8 sps:$4 sm:$0xff]   ;;  %v1408_v62 = vld [vmem:[#allocation7 + $0x1b0] ss:$8 sps:$4 sm:$0xff]  }
  0x5f   :  { %818 = vmatprep.subr.bf16.mxu1 %v1358_v63  ;;  %v1410_v63 = vld [vmem:[#allocation7 + $0x1b4] ss:$8 sps:$4 sm:$0xff]   ;;  %s1548_s19 = scalar_lea.vmem %s1161_s13, 128 }
  0x60   :  { %p1549_p4 = scmp.ne.s32.totalorder %s1161_s13, %s1548_s19  ;;  %p1554_p6 = scmp.lt.s32.totalorder %s1548_s19, %s1548_s19 }
  0x61   :  { %253 = vmatpush1.bf16.msra.mxu0 %v200_v17  ;;  %v1384_v17 = vld [vmem:[#allocation7 + $0x170] ss:$8 sps:$4 sm:$0xff]  }
  0x62   :  { %855 = vmatprep.subr.bf16.mxu0 %v1344_v53  ;;  %819 = vmatpush1.bf16.msra.mxu1 %v1363_v2  ;;  %v1416_v2 = vld [vmem:[#allocation7 + $0x1c4] ss:$8 sps:$4 sm:$0xff]   ;;  %p1555_p7 = por %p1554_p6, %p1553_p5 }
  0x63   :  { %820 = vmatprep.subr.bf16.mxu1 %v1364_v3  ;;  %v1414_v3 = vld [vmem:[#allocation7 + $0x1c0] ss:$8 sps:$4 sm:$0xff]  }
  0x64   :  { %1189 = vmatmul.mubr.msk.bf16.vlgmr.msra.gmra.mrb[4].mxu0 %vm188_vm1, %v97_v12  ;;  %v1380_v12 = vld [vmem:[#allocation7 + $0x164] ss:$8 sps:$4 sm:$0xff]   ;;  %p1556_p8 = pnand %p1555_p7, %p1549_p4 }
  0x65   :  { %856 = vmatpush1.bf16.msra.mxu0 %v1342_v52 }
  0x66   :  { %857 = vmatprep.subr.bf16.mxu0 %v1350_v56  ;;  %821 = vmatpush1.bf16.msra.mxu1 %v1369_v6  ;;  %v1399_v56 = vld [vmem:[#allocation7 + $0x90] ss:$8 sps:$4 sm:$0xff]   ;;  %v1422_v6 = vld [vmem:[#allocation7 + $0x1d4] ss:$8 sps:$4 sm:$0xff]  }
  0x67   :  { %822 = vmatprep.subr.bf16.mxu1 %v1370_v7  ;;  %v1420_v7 = vld [vmem:[#allocation7 + $0x1d0] ss:$8 sps:$4 sm:$0xff]  }
  0x69   :  { %858 = vmatpush1.bf16.msra.mxu0 %v1348_v57  ;;  %v1400_v57 = vld [vmem:[#allocation7 + $0xa4] ss:$8 sps:$4 sm:$0xff]  }
  0x6a   :  { %859 = vmatprep.subr.bf16.mxu0 %v1356_v60  ;;  %823 = vmatpush1.bf16.msra.mxu1 %v1375_v10  ;;  %v1405_v60 = vld [vmem:[#allocation7 + $0xa0] ss:$8 sps:$4 sm:$0xff]   ;;  %v1428_v10 = vld [vmem:[#allocation7 + $0x1e4] ss:$8 sps:$4 sm:$0xff]  }
  0x6b   :  { %824 = vmatprep.subr.bf16.mxu1 %v1376_v11  ;;  %v1426_v11 = vld [vmem:[#allocation7 + $0x1e0] ss:$8 sps:$4 sm:$0xff]  }
  0x6d   :  { %860 = vmatpush1.bf16.msra.mxu0 %v1354_v61  ;;  %v1406_v61 = vld [vmem:[#allocation7 + $0xb4] ss:$8 sps:$4 sm:$0xff]  }
  0x6e   :  { %861 = vmatprep.subr.bf16.mxu0 %v1362_v0  ;;  %825 = vmatpush1.bf16.msra.mxu1 %v1381_v14  ;;  %v1411_v0 = vld [vmem:[#allocation7 + $0xb0] ss:$8 sps:$4 sm:$0xff]   ;;  %v1434_v14 = vld [vmem:[#allocation7 + $0x1f4] ss:$8 sps:$4 sm:$0xff]  }
  0x6f   :  { %826 = vmatprep.subr.bf16.mxu1 %v1382_v15  ;;  %v1432_v15 = vld [vmem:[#allocation7 + $0x1f0] ss:$8 sps:$4 sm:$0xff]  }
  0x71   :  { %862 = vmatpush1.bf16.msra.mxu0 %v1360_v1  ;;  %v1412_v1 = vld [vmem:[#allocation7 + $0xc4] ss:$8 sps:$4 sm:$0xff]  }
  0x72   :  { %863 = vmatprep.subr.bf16.mxu0 %v1368_v4  ;;  %827 = vmatpush1.bf16.msra.mxu1 %v1387_v18  ;;  %v1417_v4 = vld [vmem:[#allocation7 + $0xc0] ss:$8 sps:$4 sm:$0xff]  }
  0x73   :  { %828 = vmatprep.subr.bf16.mxu1 %v1388_v19 }
  0x75   :  { %864 = vmatpush1.bf16.msra.mxu0 %v1366_v5  ;;  %v1418_v5 = vld [vmem:[#allocation7 + $0xd4] ss:$8 sps:$4 sm:$0xff]  }
  0x76   :  { %865 = vmatprep.subr.bf16.mxu0 %v1374_v8  ;;  %829 = vmatpush1.bf16.msra.mxu1 %v1393_v24  ;;  %v1423_v8 = vld [vmem:[#allocation7 + $0xd0] ss:$8 sps:$4 sm:$0xff]  }
  0x79   :  { %866 = vmatpush1.bf16.msra.mxu0 %v1372_v9  ;;  %v1424_v9 = vld [vmem:[#allocation7 + $0xe4] ss:$8 sps:$4 sm:$0xff]  }
  0x7a   :  { %867 = vmatprep.subr.bf16.mxu0 %v1380_v12  ;;  %v1429_v12 = vld [vmem:[#allocation7 + $0xe0] ss:$8 sps:$4 sm:$0xff]  }
  0x7d   :  { %868 = vmatpush1.bf16.msra.mxu0 %v1378_v13  ;;  %v1430_v13 = vld [vmem:[#allocation7 + $0xf4] ss:$8 sps:$4 sm:$0xff]  }
  0x7e   :  { %869 = vmatprep.subr.bf16.mxu0 %v1386_v16  ;;  %v1435_v16 = vld [vmem:[#allocation7 + $0xf0] ss:$8 sps:$4 sm:$0xff]  }
  0x81   :  { %870 = vmatpush1.bf16.msra.mxu0 %v1384_v17 }
 0x12b   :  { %v239_v20 = vpop.f32.mrb[0].mxu0 }
 0x12c   :  { %v241_v23 = vpop.f32.mrb[1].mxu0  ;;  %v1725_v31 = vadd.f32 %v239_v20, %v115_v27  ;;  %v1392_v20 = vld [vmem:[#allocation7 + $0x184] ss:$8 sps:$4 sm:$0xff]  }
 0x12d   :  { %v243_v25 = vpop.f32.mrb[2].mxu0  ;;  %v1727_v32 = vadd.f32 %v241_v23, %v119_v28  ;;  %v1390_v23 = vld [vmem:[#allocation7 + $0x180] ss:$8 sps:$4 sm:$0xff]   ;;  %871 = vmatprep.subr.bf16.mxu0 %v1392_v20 }
 0x12e   :  { %v245_v26 = vpop.f32.mrb[3].mxu0  ;;  %v1731_v35 = vadd.f32 %v243_v25, %v115_v27  ;;  %872 = vmatpush1.bf16.msra.mxu0 %v1390_v23 }
 0x12f   :  { %v1733_v36 = vadd.f32 %v245_v26, %v119_v28  ;;  %v293_v38 = vadd.f32 %v1727_v32, %v1725_v31  ;;  %873 = vmatprep.subr.bf16.mxu0 %v1398_v54 }
 0x131   :  { %v298_v43 = vadd.f32 %v1733_v36, %v1731_v35 }
 0x132   :  { %874 = vmatpush1.bf16.msra.mxu0 %v1396_v55 }
 0x133   :  { %875 = vmatprep.subr.bf16.mxu0 %v1404_v58 }
 0x136   :  { %876 = vmatpush1.bf16.msra.mxu0 %v1402_v59 }
 0x137   :  { %v282_v37 = vpop.f32.mrb[4].mxu0  ;;  %877 = vmatprep.subr.bf16.mxu0 %v1410_v63 }
 0x138   :  { %v1737_v39 = vadd.f32 %v282_v37, %v123_v33  ;;  %v284_v40 = vpop.f32.mrb[5].mxu0 }
 0x139   :  { %v1739_v41 = vadd.f32 %v284_v40, %v127_v34  ;;  %v286_v42 = vpop.f32.mrb[6].mxu0 }
 0x13a   :  { %v1743_v44 = vadd.f32 %v286_v42, %v123_v33  ;;  %v288_v45 = vpop.f32.mrb[7].mxu0  ;;  %v294_v46 = vadd.f32 %v293_v38, %v1737_v39  ;;  %878 = vmatpush1.bf16.msra.mxu0 %v1408_v62 }
 0x13b   :  { %v1747_v48 = vadd.f32 %v288_v45, %v127_v34  ;;  %879 = vmatprep.subr.bf16.mxu0 %v1416_v2 }
 0x13c   :  { %v299_v47 = vadd.f32 %v298_v43, %v1743_v44  ;;  %v295_v49 = vadd.f32 %v294_v46, %v1739_v41 }
 0x13e   :  { %296 = vadd.xlane.f32.xlu0 %v295_v49  ;;  %v300_v50 = vadd.f32 %v299_v47, %v1747_v48  ;;  %880 = vmatpush1.bf16.msra.mxu0 %v1414_v3 }
 0x13f   :  { %881 = vmatprep.subr.bf16.mxu0 %v1422_v6 }
 0x142   :  { %301 = vadd.xlane.f32.xlu0 %v300_v50  ;;  %882 = vmatpush1.bf16.msra.mxu0 %v1420_v7 }
 0x143   :  { %883 = vmatprep.subr.bf16.mxu0 %v1428_v10 }
 0x146   :  { %884 = vmatpush1.bf16.msra.mxu0 %v1426_v11 }
 0x147   :  { %885 = vmatprep.subr.bf16.mxu0 %v1434_v14 }
 0x14a   :  { %886 = vmatpush1.bf16.msra.mxu0 %v1432_v15 }
 0x1cb   :  { %v297_v25 = vpop.xlane.xlu0 %296 }
 0x1cc   :  { %v304_v26 = vmul.f32 0.001953125, %v297_v25  ;;  %v291_v25 = vld [vmem:[%s1849_s3] sm:$0xf] }
 0x1ce   :  { %v1752_v27 = vsub.f32 %v1725_v31, %v304_v26  ;;  %v1755_v28 = vsub.f32 %v1727_v32, %v304_v26  ;;  %v1758_v33 = vsub.f32 %v1737_v39, %v304_v26  ;;  %v1761_v37 = vsub.f32 %v1739_v41, %v304_v26 }
 0x1cf   :  { %v302_v34 = vpop.xlane.xlu0 %301  ;;  %v354_v26 = vrot.slane %v291_v25, %v1714_v22 }
 0x1d0   :  { %v305_v38 = vmul.f32 0.001953125, %v302_v34  ;;  %v314_v40 = vmul.f32 %v1752_v27, %v1752_v27  ;;  %v315_v42 = vmul.f32 %v1755_v28, %v1755_v28  ;;  %v316_v31 = vmul.f32 %v1758_v33, %v1758_v33 }
 0x1d1   :  { %v317_v45 = vmul.f32 %v1761_v37, %v1761_v37  ;;  %v362_v34 = vrot.slane %v291_v25, %v1723_v30 }
 0x1d2   :  { %v1770_v32 = vsub.f32 %v1731_v35, %v305_v38  ;;  %v1773_v39 = vsub.f32 %v1733_v36, %v305_v38  ;;  %v322_v43 = vadd.f32 %v315_v42, %v314_v40  ;;  %v1776_v41 = vsub.f32 %v1743_v44, %v305_v38  ;;  %v292_v40 = vld [vmem:[%s1850_s4] sm:$0xf] }
 0x1d3   :  { %v1781_v47 = vsub.f32 %v1747_v48, %v305_v38  ;;  %v1394_v48 = vld [vmem:[#allocation7 + $0x94] ss:$8 sps:$4 sm:$0xff]   ;;  %v350_v42 = vrot.slane %v291_v25, %v1712_v21  ;;  %v387_v54 = vrot.slane %v292_v40, %v1721_v29 }
 0x1d4   :  { %v323_v46 = vadd.f32 %v322_v43, %v316_v31  ;;  %v318_v49 = vmul.f32 %v1770_v32, %v1770_v32  ;;  %v319_v35 = vmul.f32 %v1773_v39, %v1773_v39  ;;  %v320_v36 = vmul.f32 %v1776_v41, %v1776_v41  ;;  %830 = vmatprep.subr.bf16.mxu1 %v1394_v48 }
 0x1d5   :  { %v321_v44 = vmul.f32 %v1781_v47, %v1781_v47  ;;  %831 = vmatpush1.bf16.msra.mxu1 %v1399_v56  ;;  %v358_v31 = vrot.slane %v291_v25, %v1721_v29 }
 0x1d6   :  { %v324_v50 = vadd.f32 %v323_v46, %v317_v45  ;;  %v327_v51 = vadd.f32 %v319_v35, %v318_v49  ;;  %832 = vmatprep.subr.bf16.mxu1 %v1400_v57 }
 0x1d8   :  { %325 = vadd.xlane.f32.xlu1 %v324_v50  ;;  %v328_v52 = vadd.f32 %v327_v51, %v320_v36  ;;  %v383_v50 = vrot.slane %v292_v40, %v1714_v22  ;;  %v391_v51 = vrot.slane %v292_v40, %v1723_v30 }
 0x1d9   :  { %833 = vmatpush1.bf16.msra.mxu1 %v1405_v60 }
 0x1da   :  { %v329_v53 = vadd.f32 %v328_v52, %v321_v44  ;;  %834 = vmatprep.subr.bf16.mxu1 %v1406_v61 }
 0x1dc   :  { %330 = vadd.xlane.f32.xlu1 %v329_v53  ;;  %v379_v53 = vrot.slane %v292_v40, %v1712_v21 }
 0x1dd   :  { %835 = vmatpush1.bf16.msra.mxu1 %v1411_v0 }
 0x1de   :  { %836 = vmatprep.subr.bf16.mxu1 %v1412_v1 }
 0x1e1   :  { %837 = vmatpush1.bf16.msra.mxu1 %v1417_v4 }
 0x1e2   :  { %838 = vmatprep.subr.bf16.mxu1 %v1418_v5 }
 0x1e5   :  { %839 = vmatpush1.bf16.msra.mxu1 %v1423_v8 }
 0x1e6   :  { %840 = vmatprep.subr.bf16.mxu1 %v1424_v9  ;;  %v480_v9 = vld [vmem:[%s1852_s6] sm:$0x3] }
 0x1e7   :  { %v485_v10 = vrot.slane %v480_v9, %v1712_v21  ;;  %v489_v11 = vrot.slane %v480_v9, %v1714_v22 }
 0x1e9   :  { %841 = vmatpush1.bf16.msra.mxu1 %v1429_v12 }
 0x1ea   :  { %842 = vmatprep.subr.bf16.mxu1 %v1430_v13 }
 0x1ed   :  { %843 = vmatpush1.bf16.msra.mxu1 %v1435_v16 }
 0x265   :  { %v326_v17 = vpop.xlane.xlu1 %325 }
 0x266   :  { %v332_v18 = vmul.f32 0.001953125, %v326_v17 }
 0x268   :  { %v334_v19 = vadd.f32 1e-05, %v332_v18 }
 0x269   :  { %v331_v20 = vpop.xlane.xlu1 %330 }
 0x26a   :  { %1452 = vrsqrt.f32 %v334_v19  ;;  %v333_v23 = vmul.f32 0.001953125, %v331_v20 }
 0x26c   :  { %v335_v24 = vadd.f32 1e-05, %v333_v23 }
 0x26e   :  { %1454 = vrsqrt.f32 %v335_v24 }
 0x274   :  { %v1453_v38 = vpop.eup %1452 }
 0x275   :  { %v339_v43 = vmul.f32 %v1453_v38, %v1755_v28  ;;  %v341_v45 = vmul.f32 %v1453_v38, %v1761_v37  ;;  %v338_v46 = vmul.f32 %v1453_v38, %v1752_v27  ;;  %v340_v49 = vmul.f32 %v1453_v38, %v1758_v33 }
 0x277   :  { %v368_v35 = vmul.f32 %v354_v26, %v339_v43  ;;  %v370_v36 = vmul.f32 %v362_v34, %v341_v45  ;;  %v367_v52 = vmul.f32 %v350_v42, %v338_v46  ;;  %v369_v48 = vmul.f32 %v358_v31, %v340_v49  ;;  %v1436_v43 = vld [vmem:[#allocation8 + $0x40] sm:$0xff]  }
 0x278   :  { %v1455_v44 = vpop.eup %1454  ;;  %v1437_v45 = vld [vmem:[#allocation8] sm:$0xff]   ;;  %1280 = vmatprep.subr.bf16.mxu1 %v1436_v43 }
 0x279   :  { %v343_v28 = vmul.f32 %v1455_v44, %v1773_v39  ;;  %v345_v37 = vmul.f32 %v1455_v44, %v1781_v47  ;;  %v342_v27 = vmul.f32 %v1455_v44, %v1770_v32  ;;  %v344_v33 = vmul.f32 %v1455_v44, %v1776_v41 }
 0x27a   :  { %v397_v56 = vadd.f32 %v383_v50, %v368_v35  ;;  %v399_v58 = vadd.f32 %v391_v51, %v370_v36  ;;  %v396_v59 = vadd.f32 %v379_v53, %v367_v52  ;;  %v398_v61 = vadd.f32 %v387_v54, %v369_v48 }
 0x27b   :  { %v372_v55 = vmul.f32 %v354_v26, %v343_v28  ;;  %v374_v57 = vmul.f32 %v362_v34, %v345_v37  ;;  %v371_v30 = vmul.f32 %v350_v42, %v342_v27  ;;  %v373_v60 = vmul.f32 %v358_v31, %v344_v33  ;;  %v1438_v33 = vld [vmem:[#allocation8 + $0x48] sm:$0xff]  }
 0x27c   :  { %v405_v1 = vmax.f32 %v397_v56, 0.0  ;;  %v407_v2 = vmax.f32 %v399_v58, 0.0  ;;  %v404_v3 = vmax.f32 %v396_v59, 0.0  ;;  %v406_v4 = vmax.f32 %v398_v61, 0.0  ;;  %v1440_v56 = vld [vmem:[#allocation8 + $0x50] sm:$0xff]   ;;  %v1442_v58 = vld [vmem:[#allocation8 + $0x58] sm:$0xff]  }
 0x27d   :  { %v401_v62 = vadd.f32 %v383_v50, %v372_v55  ;;  %v403_v63 = vadd.f32 %v391_v51, %v374_v57  ;;  %v400_v0 = vadd.f32 %v379_v53, %v371_v30  ;;  %v402_v29 = vadd.f32 %v387_v54, %v373_v60  ;;  %v1439_v55 = vld [vmem:[#allocation8 + $0x8] sm:$0xff]   ;;  %v1441_v57 = vld [vmem:[#allocation8 + $0x10] sm:$0xff]   ;;  %v1443_v30 = vld [vmem:[#allocation8 + $0x18] sm:$0xff]  }
 0x27e   :  { %v1444_v59 = vld [vmem:[#allocation8 + $0x60] sm:$0xff]   ;;  %v1446_v61 = vld [vmem:[#allocation8 + $0x68] sm:$0xff]  }
 0x27f   :  { %v409_v39 = vmax.f32 %v401_v62, 0.0  ;;  %v411_v47 = vmax.f32 %v403_v63, 0.0  ;;  %v408_v32 = vmax.f32 %v400_v0, 0.0  ;;  %v410_v41 = vmax.f32 %v402_v29, 0.0  ;;  %v1445_v60 = vld [vmem:[#allocation8 + $0x20] sm:$0xff]   ;;  %v1447_v62 = vld [vmem:[#allocation8 + $0x28] sm:$0xff]  }
 0x280   :  { %v1448_v63 = vld [vmem:[#allocation8 + $0x70] sm:$0xff]   ;;  %v1450_v29 = vld [vmem:[#allocation8 + $0x78] sm:$0xff]  }
 0x281   :  { %v413_v5 = vpack.c.bf16 %v409_v39, %v405_v1  ;;  %v415_v6 = vpack.c.bf16 %v411_v47, %v407_v2  ;;  %v412_v7 = vpack.c.bf16 %v408_v32, %v404_v3  ;;  %v414_v8 = vpack.c.bf16 %v410_v41, %v406_v4  ;;  %v1449_v0 = vld [vmem:[#allocation8 + $0x30] sm:$0xff]   ;;  %v1451_v1 = vld [vmem:[#allocation8 + $0x38] sm:$0xff]  }
 0x282   :  { %v898_v41 = vld [vmem:[%s1853_s7] sm:$0x3] }
 0x283   :  { %844 = vmatprep.mubr.bf16.mxu1 %v413_v5  ;;  %887 = vmatprep.mubr.bf16.mxu0 %v415_v6  ;;  %v899_v5 = vld [vmem:[%s1854_s8] sm:$0x3]  ;;  %v937_v6 = vrot.slane %v898_v41, %v1712_v21 }
 0x284   :  { %845 = vmatmul.mubr.bf16.vlgmr.msra.gmra.mrb[0].mxu1 %v412_v7  ;;  %888 = vmatmul.mubr.bf16.vlgmr.msra.gmra.mrb[8].mxu0 %v414_v8  ;;  %v941_v7 = vrot.slane %v898_v41, %v1714_v22 }
 0x285   :  { %1281 = vmatpush3.bf16.msra.mxu1 %v1437_v45 }
 0x286   :  { %1282 = vmatprep.subr.bf16.mxu1 %v1438_v33 }
 0x289   :  { %1283 = vmatpush3.bf16.msra.mxu1 %v1439_v55 }
 0x28a   :  { %1284 = vmatprep.subr.bf16.mxu1 %v1440_v56 }
 0x28d   :  { %1285 = vmatpush3.bf16.msra.mxu1 %v1441_v57 }
 0x28e   :  { %1286 = vmatprep.subr.bf16.mxu1 %v1442_v58 }
 0x291   :  { %1287 = vmatpush3.bf16.msra.mxu1 %v1443_v30 }
 0x292   :  { %1288 = vmatprep.subr.bf16.mxu1 %v1444_v59 }
 0x295   :  { %1289 = vmatpush3.bf16.msra.mxu1 %v1445_v60 }
 0x296   :  { %1290 = vmatprep.subr.bf16.mxu1 %v1446_v61 }
 0x299   :  { %1291 = vmatpush3.bf16.msra.mxu1 %v1447_v62 }
 0x29a   :  { %1292 = vmatprep.subr.bf16.mxu1 %v1448_v63 }
 0x29d   :  { %1293 = vmatpush3.bf16.msra.mxu1 %v1449_v0 }
 0x29e   :  { %1294 = vmatprep.subr.bf16.mxu1 %v1450_v29 }
 0x2a1   :  { %1295 = vmatpush3.bf16.msra.mxu1 %v1451_v1 }
 0x357   :  { %v846_v12 = vpop.f32.mrb[0].mxu1  ;;  %v889_v13 = vpop.f32.mrb[8].mxu0 }
 0x358   :  { %v847_v14 = vadd.f32 %v846_v12, %v485_v10  ;;  %v848_v15 = vpop.f32.mrb[1].mxu1  ;;  %v891_v16 = vpop.f32.mrb[9].mxu0  ;;  %v956_v12 = vrot.slane %v899_v5, %v1714_v22 }
 0x359   :  { %v849_v17 = vadd.f32 %v848_v15, %v489_v11  ;;  %v850_v18 = vpop.f32.mrb[2].mxu1  ;;  %v893_v19 = vpop.f32.mrb[10].mxu0 }
 0x35a   :  { %v890_v20 = vadd.f32 %v889_v13, %v847_v14  ;;  %v851_v23 = vadd.f32 %v850_v18, %v485_v10  ;;  %v852_v24 = vpop.f32.mrb[3].mxu1  ;;  %v895_v25 = vpop.f32.mrb[11].mxu0 }
 0x35b   :  { %v892_v26 = vadd.f32 %v891_v16, %v849_v17  ;;  %v853_v34 = vadd.f32 %v852_v24, %v489_v11  ;;  %v952_v11 = vrot.slane %v899_v5, %v1712_v21 }
 0x35c   :  { %v894_v38 = vadd.f32 %v893_v19, %v851_v23 }
 0x35d   :  { %v896_v40 = vadd.f32 %v895_v25, %v853_v34  ;;  %v900_v42 = vadd.f32 %v892_v26, %v890_v20 }
 0x35f   :  { %901 = vadd.xlane.f32.xlu0 %v900_v42  ;;  %v903_v31 = vadd.f32 %v896_v40, %v894_v38 }
 0x361   :  { %904 = vadd.xlane.f32.xlu1 %v903_v31 }
 0x3ec   :  { %v902_v46 = vpop.xlane.xlu0 %901 }
 0x3ed   :  { %v907_v49 = vmul.f32 0.00390625, %v902_v46  ;;  %v1254_v46 = vld [vmem:[%s1856_s10] ss:$0 sm:$0xff] }
 0x3ee   :  { %v905_v35 = vpop.xlane.xlu1 %904 }
 0x3ef   :  { %v909_v50 = vsub.f32 %v890_v20, %v907_v49  ;;  %v910_v36 = vsub.f32 %v892_v26, %v907_v49  ;;  %v908_v51 = vmul.f32 0.00390625, %v905_v35 }
 0x3f1   :  { %v911_v44 = vsub.f32 %v894_v38, %v908_v51  ;;  %v912_v52 = vsub.f32 %v896_v40, %v908_v51  ;;  %v913_v53 = vmul.f32 %v909_v50, %v909_v50  ;;  %v914_v48 = vmul.f32 %v910_v36, %v910_v36 }
 0x3f3   :  { %v917_v54 = vadd.f32 %v914_v48, %v913_v53  ;;  %v915_v28 = vmul.f32 %v911_v44, %v911_v44  ;;  %v916_v37 = vmul.f32 %v912_v52, %v912_v52 }
 0x3f5   :  { %918 = vadd.xlane.f32.xlu0 %v917_v54  ;;  %v920_v27 = vadd.f32 %v916_v37, %v915_v28 }
 0x3f7   :  { %921 = vadd.xlane.f32.xlu1 %v920_v27 }
 0x482   :  { %v919_v39 = vpop.xlane.xlu0 %918 }
 0x483   :  { %v923_v2 = vmul.f32 0.00390625, %v919_v39 }
 0x484   :  { %v922_v47 = vpop.xlane.xlu1 %921 }
 0x485   :  { %v925_v3 = vadd.f32 1e-05, %v923_v2  ;;  %v924_v32 = vmul.f32 0.00390625, %v922_v47 }
 0x487   :  { %1456 = vrsqrt.f32 %v925_v3  ;;  %v926_v4 = vadd.f32 1e-05, %v924_v32 }
 0x489   :  { %1458 = vrsqrt.f32 %v926_v4 }
 0x491   :  { %v1457_v8 = vpop.eup %1456 }
 0x492   :  { %v929_v9 = vmul.f32 %v1457_v8, %v909_v50  ;;  %v930_v10 = vmul.f32 %v1457_v8, %v910_v36 }
 0x493   :  { %v1459_v13 = vpop.eup %1458 }
 0x494   :  { %v931_v14 = vmul.f32 %v1459_v13, %v911_v44  ;;  %v932_v15 = vmul.f32 %v1459_v13, %v912_v52  ;;  %v945_v16 = vmul.f32 %v941_v7, %v930_v10  ;;  %v944_v17 = vmul.f32 %v937_v6, %v929_v9 }
 0x496   :  { %v947_v18 = vmul.f32 %v941_v7, %v932_v15  ;;  %v960_v19 = vadd.f32 %v956_v12, %v945_v16  ;;  %v946_v20 = vmul.f32 %v937_v6, %v931_v14  ;;  %v959_v23 = vadd.f32 %v952_v11, %v944_v17 }
 0x498   :  { %v962_v24 = vadd.f32 %v956_v12, %v947_v18  ;;  %v961_v25 = vadd.f32 %v952_v11, %v946_v20  ;;  %v964_v26 = vmax.f32 %v960_v19, 0.0  ;;  %v963_v38 = vmax.f32 %v959_v23, 0.0 }
 0x49a   :  { %v966_v34 = vmax.f32 %v962_v24, 0.0  ;;  %v965_v40 = vmax.f32 %v961_v25, 0.0 }
 0x49c   :  { %v968_v42 = vpack.c.bf16 %v966_v34, %v964_v26  ;;  %v967_v31 = vpack.c.bf16 %v965_v40, %v963_v38 }
 0x49e   :  { %1136 = vmatprep.mubr.bf16.mxu1 %v968_v42 }
 0x49f   :  { %1137 = vmatmul.mubr.bf16.vlgmr.msra.gmra.mrb[4].mxu1 %v967_v31 }
 0x572   :  { %v1296_v21 = vpop.f32.mrb[4].mxu1 }
 0x573   :  { %v1297_v22 = vpop.f32.mrb[5].mxu1 }
 0x574   :  { %v1298_v43 = vadd.f32 %v1297_v22, %v1296_v21  ;;  %v1299_v45 = vpop.f32.mrb[6].mxu1 }
 0x575   :  { %v1300_v49 = vpop.f32.mrb[7].mxu1 }
 0x576   :  { %v1301_v35 = vadd.f32 %v1300_v49, %v1299_v45  ;;  %v1139_v50 = vadd.f32 %v1298_v43, %v1254_v46 }
 0x578   :  { %v1142_v36 = vadd.f32 %v1301_v35, %v1254_v46 }
 0x57a   :  { %v1278_v51 = vpack.c.bf16 %v1142_v36, %v1139_v50 }
 0x57c   :  { %1279 = vst [vmem:[#allocation10] sm:$0xff] %v1278_v51  }
 0x57d   :  { %1559 = shalt.err (!%p1556_p8)
}
 0x57e   :  { %s1560_s10 = scalar_lea.hbm %s1857_s11, 128 }
 0x57f   :  { %p1561_p9 = scmp.ne.s32.totalorder %s1857_s11, %s1560_s10  ;;  %p1564_p10 = scmp.lt.u32.totalorder %s1560_s10, %s1857_s11 }
 0x581   :  { %p1566_p11 = pnand %p1564_p10, %p1561_p9 }
 0x583   :  { %1569 = shalt.err (!%p1566_p11)
}
 0x584   :  { %1166 = dma.vmem_to_hbm [thread:$0]  %s1161_s13, 128, %s1857_s11, [#allocation4], %s1586_s5, %s1586_s5, %s1587_s1  }
 0x585   :  { %1576 = dma.done.wait [#allocation4], 128  }
 0x586   :  { %1577 = vsyncadd [#allocation4], 4294967168 }
 0x587   :  { %1170 = vsyncpa [#allocation3], 1 }
 0x588   :  { %1171 = vsyncpa [#allocation6], 1 }
 0x589   :  { %1172 = vsyncpa [#allocation9], 1 }
 0x58a   :  { %1173 = vsyncpa [#allocation4], 1 }

</bundles_post_ra>
